<compile_context>
chip_gen: v5e
topology: v5e:2x2
jax: 0.10.0
libtpu: 0.0.40
codegen_flags: <defaults>
</compile_context>

<pallas_src>
import jax
import jax.numpy as jnp
from jax.experimental import pallas as pl
from jax.experimental.pallas import tpu as pltpu


def _round_up(n, m):
    return ((n + m - 1) // m) * m


def _pick_tile_n(dp, cap=512):
    """Largest multiple of 128 that divides dp and is <= cap (lane-dense dec stores)."""
    best, t = 128, 128
    while t <= min(dp, cap):
        if dp % t == 0:
            best = t
        t += 128
    return best


def _vmem_cap_bytes():
    """Per-generation VMEM budget (leave headroom for Mosaic internal scratch)."""
    try:
        cap = int(pltpu.get_tpu_info().vmem_capacity_bytes)
    except Exception:
        cap = 64 * 1024 * 1024        # conservative fallback (v7x per-TC VMEM)
    return max(32 * 1024 * 1024, min(int(cap * 3 // 4), 112 * 1024 * 1024))


def autoencoder_kernel(x_ref, we_ref, be_ref, wd_ref, bd_ref,
                       enc_ref, dec_ref, h_ref):
    # x_ref:   (TILE_B, Dp)      input tile (native dtype), resident across j
    # we_ref:  (Dp, Hp)          encoder weight (compute dtype), resident
    # be_ref:  (1, Hp)           encoder bias, f32, resident
    # wd_ref:  (Hp, TILE_N)      decoder weight column block (compute dtype)
    # bd_ref:  (1, TILE_N)       decoder bias column block, f32
    # enc_ref: (TILE_B, Hp)      encoded output tile, resident across j
    # dec_ref: (TILE_B, TILE_N)  decoded output column tile
    # h_ref:   (TILE_B, Hp) f32  scratch: encoder activations, reused over j
    j = pl.program_id(1)

    # Encode once per batch tile (j == 0) and reuse for every decoder column
    # block.  Padded concept lanes are exactly tanh(0 + 0) = 0 and the padded
    # W_dec rows are 0, so the Hp-wide contraction below is exact.
    @pl.when(j == 0)
    def _():
        x = x_ref[...].astype(we_ref.dtype)       # in-kernel cast (VPU, hidden under DMA)
        h = jnp.dot(x, we_ref[...], preferred_element_type=jnp.float32)
        h = jax.lax.tanh(h + be_ref[...])         # f32 bias-add + EUP tanh
        h_ref[...] = h
        enc_ref[...] = h.astype(enc_ref.dtype)    # lane-dense 128-wide store

    # Decode this column block: tanh(h @ W_dec[:, jblk] + b_dec[jblk]).
    d = jnp.dot(h_ref[...].astype(wd_ref.dtype), wd_ref[...],
                preferred_element_type=jnp.float32)
    d = jax.lax.tanh(d + bd_ref[...])
    dec_ref[...] = d.astype(dec_ref.dtype)


def pad_params(w_enc, b_enc, w_dec, b_dec, compute_dtype=jnp.bfloat16):
    """Pad/cast the (static) AutoEncoder parameters ONCE, outside the per-call
    jitted forward path.  Returns (padded_params, dims) where dims is a plain
    tuple of Python ints (pass it statically to the jitted forward)."""
    D, nconcept = w_enc.shape
    Dp = _round_up(D, 128)
    Hp = _round_up(nconcept, 128)
    mm_dtype = jnp.dtype(compute_dtype)

    def pad2(a, shape, dtype):
        a = a.astype(dtype)
        if a.shape == shape:
            return a
        return jnp.zeros(shape, dtype).at[:a.shape[0], :a.shape[1]].set(a)

    we_p = pad2(w_enc, (Dp, Hp), mm_dtype)
    wd_p = pad2(w_dec, (Hp, Dp), mm_dtype)
    be_p = pad2(b_enc.reshape(1, -1), (1, Hp), jnp.float32)   # biases stay f32
    bd_p = pad2(b_dec.reshape(1, -1), (1, Dp), jnp.float32)
    return (we_p, be_p, wd_p, bd_p), (D, nconcept, Dp, Hp)


def autoencoder_forward(x, params, dims):
    """forward(x) = (encode(x), decode(encode(x)).view_as(x)).

    x: (B, C, H, W).  params/dims come from pad_params; dims must be passed
    statically (jit static_argnums) since it drives tiling.  Outputs are
    streamed at the compute dtype (bf16 by default) to halve HBM writes."""
    we_p, be_p, wd_p, bd_p = params
    D, nconcept, Dp, Hp = dims
    B = x.shape[0]
    mm_dtype = we_p.dtype
    out_dtype = mm_dtype

    # ---- tiling ---------------------------------------------------------
    sub = 16 if jnp.dtype(mm_dtype).itemsize == 2 else 8   # packed-sublane multiple
    # >= 4 batch tiles when possible: megacore sharding (v7x) + DMA overlap.
    TILE_B = min(512, max(sub, _round_up(-(-B // 4), sub)))
    TILE_N = _pick_tile_n(Dp, cap=512)

    VMEM_CAP = _vmem_cap_bytes()
    x_bytes = jnp.dtype(x.dtype).itemsize
    mm_bytes = jnp.dtype(mm_dtype).itemsize
    out_bytes = jnp.dtype(out_dtype).itemsize

    def vmem_estimate(tile_b):
        resident = 2 * (Dp * Hp * mm_bytes + Hp * 4)          # W_enc + b_enc buffers
        streamed = 2 * (tile_b * Dp * x_bytes                 # x tile
                        + tile_b * Hp * out_bytes             # enc tile
                        + Hp * TILE_N * mm_bytes + TILE_N * 4 # W_dec / b_dec blocks
                        + tile_b * TILE_N * out_bytes)        # dec tile
        scratch = tile_b * Hp * 4                             # h f32 scratch
        temps = tile_b * (Hp + TILE_N) * 4                    # live f32 h/d before cast
        return resident + streamed + scratch + temps + (2 << 20)

    while TILE_B > sub and vmem_estimate(TILE_B) > VMEM_CAP:
        TILE_B = max(sub, _round_up(TILE_B // 2, sub))        # keep sublane multiple
    Bp = _round_up(B, TILE_B)

    # ---- operand alignment (skip copies when already aligned) ------------
    x_flat = x.reshape(B, D)                                  # torch x.view(B, -1)
    if B == Bp and D == Dp:
        x_in = x_flat                                         # zero-copy fast path
    else:
        x_in = jnp.zeros((Bp, Dp), x.dtype).at[:B, :D].set(x_flat)

    grid = (Bp // TILE_B, Dp // TILE_N)

    enc_p, dec_p = pl.pallas_call(
        autoencoder_kernel,
        out_shape=(
            jax.ShapeDtypeStruct((Bp, Hp), out_dtype),
            jax.ShapeDtypeStruct((Bp, Dp), out_dtype),
        ),
        grid=grid,
        in_specs=[
            pl.BlockSpec((TILE_B, Dp), lambda i, j: (i, 0)),    # x tile, resident over j
            pl.BlockSpec((Dp, Hp), lambda i, j: (0, 0)),        # W_enc resident
            pl.BlockSpec((1, Hp), lambda i, j: (0, 0)),         # b_enc resident
            pl.BlockSpec((Hp, TILE_N), lambda i, j: (0, j)),    # W_dec column block
            pl.BlockSpec((1, TILE_N), lambda i, j: (0, j)),     # b_dec column block
        ],
        out_specs=(
            pl.BlockSpec((TILE_B, Hp), lambda i, j: (i, 0)),    # enc, resident over j
            pl.BlockSpec((TILE_B, TILE_N), lambda i, j: (i, j)),# dec column tiles
        ),
        scratch_shapes=[pltpu.VMEM((TILE_B, Hp), jnp.float32)], # h, reused over j
        compiler_params=pltpu.CompilerParams(
            dimension_semantics=("parallel", "arbitrary"),      # i: megacore; j: carries h
            vmem_limit_bytes=int(VMEM_CAP),
        ),
    )(x_in, we_p, be_p, wd_p, bd_p)

    encoded = enc_p if (Bp == B and Hp == nconcept) else enc_p[:B, :nconcept]
    if Bp == B and Dp == D:
        decoded = dec_p.reshape(x.shape)                        # decoded.view_as(x)
    else:
        decoded = dec_p[:B, :D].reshape(x.shape)
    return encoded, decoded


def reference_forward(x, w_enc, b_enc, w_dec, b_dec):
    B = x.shape[0]
    x_flat = x.reshape(B, -1)
    h = jnp.tanh(x_flat @ w_enc + b_enc)
    d = jnp.tanh(h @ w_dec + b_dec)
    return h, d.reshape(x.shape)


if __name__ == "__main__":
    key = jax.random.PRNGKey(0)
    B, C, Hs, Ws = 2, 4, 16, 16          # small NCHW input (demo only)
    D = C * Hs * Ws
    nconcept = 32                        # hidden / concept dim

    kx, kwe, kbe, kwd, kbd = jax.random.split(key, 5)
    x = jax.random.normal(kx, (B, C, Hs, Ws), dtype=jnp.float32)
    w_enc = jax.random.normal(kwe, (D, nconcept), dtype=jnp.float32) * 0.05
    b_enc = jax.random.normal(kbe, (nconcept,), dtype=jnp.float32) * 0.05
    w_dec = jax.random.normal(kwd, (nconcept, D), dtype=jnp.float32) * 0.05
    b_dec = jax.random.normal(kbd, (D,), dtype=jnp.float32) * 0.05

    fwd = jax.jit(autoencoder_forward, static_argnums=(2,))
    enc_ref_v, dec_ref_v = reference_forward(x, w_enc, b_enc, w_dec, b_dec)

    # f32 compute path: exact parity with the PyTorch forward.
    params32, dims = pad_params(w_enc, b_enc, w_dec, b_dec, compute_dtype=jnp.float32)
    enc32, dec32 = fwd(x, params32, dims)
    jax.block_until_ready((enc32, dec32))
    assert enc32.shape == (B, nconcept)
    assert dec32.shape == x.shape
    assert jnp.allclose(enc32, enc_ref_v, atol=1e-5, rtol=1e-5)
    assert jnp.allclose(dec32, dec_ref_v, atol=1e-5, rtol=1e-5)

    # Default bf16 compute path: halves x-read / dec-write HBM traffic
    # (f32 accumulate / bias / tanh inside the kernel), looser tolerance.
    params16, dims16 = pad_params(w_enc, b_enc, w_dec, b_dec)
    enc16, dec16 = fwd(x, params16, dims16)
    jax.block_until_ready((enc16, dec16))
    assert enc16.shape == (B, nconcept)
    assert dec16.shape == x.shape
    assert jnp.allclose(enc16.astype(jnp.float32), enc_ref_v, atol=5e-2, rtol=5e-2)
    assert jnp.allclose(dec16.astype(jnp.float32), dec_ref_v, atol=5e-2, rtol=5e-2)

    print("KERNEL_OK")
</pallas_src>

<mosaic_0001>
module attributes {stable_mosaic.version = 11 : i64} {
  func.func @autoencoder_kernel(%arg0: i32, %arg1: i32, %arg2: memref<8x1024xf32, #tpu.memory_space<vmem>>, %arg3: memref<1024x128xf32, #tpu.memory_space<vmem>>, %arg4: memref<1x128xf32, #tpu.memory_space<vmem>>, %arg5: memref<128x512xf32, #tpu.memory_space<vmem>>, %arg6: memref<1x512xf32, #tpu.memory_space<vmem>>, %arg7: memref<8x128xf32, #tpu.memory_space<vmem>>, %arg8: memref<8x512xf32, #tpu.memory_space<vmem>>, %arg9: memref<8x128xf32, #tpu.memory_space<vmem>>) attributes {dimension_semantics = [#tpu.dimension_semantics<parallel>, #tpu.dimension_semantics<arbitrary>], iteration_bounds = array<i64: 1, 2>, scalar_prefetch = 0 : i64, scratch_operands = 1 : i64, tpu.core_type = #tpu.core_type<tc>, window_params = [{transform_indices = @transform_0, window_bounds = array<i64: 8, 1024>}, {pipeline_mode = #tpu.pipeline_mode<synchronous>, transform_indices = @transform_1, window_bounds = array<i64: 1024, 128>}, {pipeline_mode = #tpu.pipeline_mode<synchronous>, transform_indices = @transform_2, window_bounds = array<i64: 1, 128>}, {transform_indices = @transform_3, window_bounds = array<i64: 128, 512>}, {transform_indices = @transform_4, window_bounds = array<i64: 1, 512>}, {transform_indices = @transform_5, window_bounds = array<i64: 8, 128>}, {transform_indices = @transform_6, window_bounds = array<i64: 8, 512>}]} {
    %c0_i32 = arith.constant 0 : i32
    %0 = arith.cmpi eq, %arg1, %c0_i32 : i32
    %1 = arith.extui %0 : i1 to i32
    %c0_i32_0 = arith.constant 0 : i32
    %2 = arith.cmpi ne, %1, %c0_i32_0 : i32
    scf.if %2 {
      %c0_8 = arith.constant 0 : index
      %c0_9 = arith.constant 0 : index
      %11 = vector.load %arg2[%c0_8, %c0_9] : memref<8x1024xf32, #tpu.memory_space<vmem>>, vector<8x1024xf32>
      %c0_10 = arith.constant 0 : index
      %c0_11 = arith.constant 0 : index
      %12 = vector.load %arg3[%c0_10, %c0_11] : memref<1024x128xf32, #tpu.memory_space<vmem>>, vector<1024x128xf32>
      %cst_12 = arith.constant dense<0.000000e+00> : vector<8x128xf32>
      %13 = tpu.matmul %11, %12, %cst_12 {dimension_numbers = #tpu.dot_dimension_numbers<[1], [0], [0], [1], [0, 0, 1, 1], [], []>} : vector<8x1024xf32>, vector<1024x128xf32>, vector<8x128xf32> -> vector<8x128xf32>
      %c0_13 = arith.constant 0 : index
      %c0_14 = arith.constant 0 : index
      %14 = vector.load %arg4[%c0_13, %c0_14] : memref<1x128xf32, #tpu.memory_space<vmem>>, vector<1x128xf32>
      %15 = vector.broadcast %14 : vector<1x128xf32> to vector<8x128xf32>
      %16 = arith.addf %13, %15 : vector<8x128xf32>
      %17 = math.tanh %16 : vector<8x128xf32>
      %c0_15 = arith.constant 0 : index
      %c0_16 = arith.constant 0 : index
      %18 = vector.load %arg9[%c0_15, %c0_16] : memref<8x128xf32, #tpu.memory_space<vmem>>, vector<8x128xf32>
      tpu.vector_store %arg9[%c0_15, %c0_16], %17 {strides = array<i32>} : memref<8x128xf32, #tpu.memory_space<vmem>>, vector<8x128xf32>,
      %c0_17 = arith.constant 0 : index
      %c0_18 = arith.constant 0 : index
      %19 = vector.load %arg7[%c0_17, %c0_18] : memref<8x128xf32, #tpu.memory_space<vmem>>, vector<8x128xf32>
      tpu.vector_store %arg7[%c0_17, %c0_18], %17 {strides = array<i32>} : memref<8x128xf32, #tpu.memory_space<vmem>>, vector<8x128xf32>,
    } else {
    }
    %c0 = arith.constant 0 : index
    %c0_1 = arith.constant 0 : index
    %3 = vector.load %arg9[%c0, %c0_1] : memref<8x128xf32, #tpu.memory_space<vmem>>, vector<8x128xf32>
    %c0_2 = arith.constant 0 : index
    %c0_3 = arith.constant 0 : index
    %4 = vector.load %arg5[%c0_2, %c0_3] : memref<128x512xf32, #tpu.memory_space<vmem>>, vector<128x512xf32>
    %cst = arith.constant dense<0.000000e+00> : vector<8x512xf32>
    %5 = tpu.matmul %3, %4, %cst {dimension_numbers = #tpu.dot_dimension_numbers<[1], [0], [0], [1], [0, 0, 1, 1], [], []>} : vector<8x128xf32>, vector<128x512xf32>, vector<8x512xf32> -> vector<8x512xf32>
    %c0_4 = arith.constant 0 : index
    %c0_5 = arith.constant 0 : index
    %6 = vector.load %arg6[%c0_4, %c0_5] : memref<1x512xf32, #tpu.memory_space<vmem>>, vector<1x512xf32>
    %7 = vector.broadcast %6 : vector<1x512xf32> to vector<8x512xf32>
    %8 = arith.addf %5, %7 : vector<8x512xf32>
    %9 = math.tanh %8 : vector<8x512xf32>
    %c0_6 = arith.constant 0 : index
    %c0_7 = arith.constant 0 : index
    %10 = vector.load %arg8[%c0_6, %c0_7] : memref<8x512xf32, #tpu.memory_space<vmem>>, vector<8x512xf32>
    tpu.vector_store %arg8[%c0_6, %c0_7], %9 {strides = array<i32>} : memref<8x512xf32, #tpu.memory_space<vmem>>, vector<8x512xf32>,
    return
  }
  func.func @transform_0(%arg0: i32, %arg1: i32) -> (i32, i32) {
    %c0_i32 = arith.constant 0 : i32
    %c0_i32_0 = arith.constant 0 : i32
    return %arg0, %c0_i32 : i32, i32
  }
  func.func @transform_1(%arg0: i32, %arg1: i32) -> (i32, i32) {
    %c0_i32 = arith.constant 0 : i32
    %c0_i32_0 = arith.constant 0 : i32
    %c0_i32_1 = arith.constant 0 : i32
    return %c0_i32, %c0_i32_0 : i32, i32
  }
  func.func @transform_2(%arg0: i32, %arg1: i32) -> (i32, i32) {
    %c0_i32 = arith.constant 0 : i32
    %c0_i32_0 = arith.constant 0 : i32
    %c0_i32_1 = arith.constant 0 : i32
    return %c0_i32, %c0_i32_0 : i32, i32
  }
  func.func @transform_3(%arg0: i32, %arg1: i32) -> (i32, i32) {
    %c0_i32 = arith.constant 0 : i32
    %c0_i32_0 = arith.constant 0 : i32
    return %c0_i32, %arg1 : i32, i32
  }
  func.func @transform_4(%arg0: i32, %arg1: i32) -> (i32, i32) {
    %c0_i32 = arith.constant 0 : i32
    %c0_i32_0 = arith.constant 0 : i32
    return %c0_i32, %arg1 : i32, i32
  }
  func.func @transform_5(%arg0: i32, %arg1: i32) -> (i32, i32) {
    %c0_i32 = arith.constant 0 : i32
    %c0_i32_0 = arith.constant 0 : i32
    return %arg0, %c0_i32 : i32, i32
  }
  func.func @transform_6(%arg0: i32, %arg1: i32) -> (i32, i32) {
    %c0_i32 = arith.constant 0 : i32
    return %arg0, %arg1 : i32, i32
  }
}

</mosaic_0001>

<bundles_post_ra>
// kernel: autoencoder_forward.1
= control target key start
LH: loop header
LB: loop body
LE: loop exit
PB: predicated region body
PF: predicated region fallthrough
CT: control target
= control target key end

     0   :  { %s1477_s0 = inlined_call_operand.vmem [shape: f32[8,1024], index: 0, kind: input, shape index: {}]   ;;  %s1478_s1 = inlined_call_operand.hbm [shape: f32[1024,128], index: 1, kind: input, shape index: {}]   ;;  %s1479_s2 = inlined_call_operand.vmem [shape: f32[1,128], index: 2, kind: input, shape index: {}]   ;;  %s1480_s3 = inlined_call_operand.hbm [shape: f32[128,1024], index: 3, kind: input, shape index: {}]   ;;  %s1481_s4 = inlined_call_operand.vmem [shape: f32[1,1024], index: 4, kind: input, shape index: {}]   ;;  %s1482_s5 = inlined_call_operand.vmem [shape: f32[8,128], index: 5, kind: output, shape index: {0}]   ;;  %s1483_s6 = inlined_call_operand.vmem [shape: f32[8,1024], index: 6, kind: output, shape index: {1}]  }
   0x1   :  { %1484 = sst [smem:[#allocation9_spill]] %s1478_s1 }
   0x2   :  { %12 = vsyncpa [#allocation4], 0 }
   0x3   :  { %13 = vsyncpa [#allocation6], 0 }
   0x4   :  { %15 = vsyncpa [#allocation6 + $0x1], 0  ;;  %s1250_s21 = smov 0   ;;  %s1252_s22 = smov 0  }
   0x5   :  { %s1254_s23 = smov 0   ;;  %s1256_s24 = smov 0  }
   0x6   :  { %s1258_s25 = smov 0   ;;  %s1260_s26 = smov 0  }
   0x7 LB: > { %s991_s27 = sadd.s32 4294967295, %s1207_s26   ;;  %p121_p0 = scmp.ne.s32.totalorder %s1191_s22, %s1187_s21  ;;  %s1207_s26 = sphi %s1260_s26, %s21_s26   ;;  %s1203_s25 = sphi %s1258_s25, %s1495_s25   ;;  %s1199_s24 = sphi %s1256_s24, %s1494_s24   ;;  %s1195_s23 = sphi %s1254_s23, %s1493_s23   ;;  %s1191_s22 = sphi %s1252_s22, %s1492_s22   ;;  %s1187_s21 = sphi %s1250_s21, %s1491_s21  }
   0x8   : > { %p1280_p1 = scmp.eq.s32.totalorder %s991_s27, 0  ;;  %p993_p2 = scmp.ge.s32.totalorder %s1207_s26, 1 }
   0x9   : > { %p212_p3 = scmp.lt.s32.totalorder %s1207_s26, 3  ;;  %s1487_s1 = sld [smem:[#allocation9_spill]] }
   0xa   : > { %p1288_p4 = por %p1280_p1, %p121_p0  ;;  %s1209_s10 = smov [#allocation3]  }
   0xb   : > { %p1295_p5 = pnand %p993_p2, %p212_p3  ;;  %s233_s11 = sshll.u32 %s1209_s10, 4  ;;  %s234_s11 = int_to_ptr.vmem [resolvable:$true] %s233_s11 }
   0xc   : > { %s1210_s12 = smov 128   ;;  %s1211_s13 = smov 8  }
   0xd   : > { %p1017_p6 = pneg %p1295_p5  ;;  %s30_s14 = sadd.s32 1, %s1203_s25 }
   0xe   : > { %p31_p8 = scmp.ge.s32.totalorder %s30_s14, 2  ;;  %s108_s15 = sadd.s32 1, %s1195_s23 }
   0xf   : > { %s231_s8 = sshll.u32 %s1487_s1, 4  ;;  %p1018_p7 = pnand %p1017_p6, %p1280_p1  ;;  %s232_s8 = int_to_ptr.hbm [resolvable:$true] %s231_s8 }
  0x10   : > { %p115_p9 = scmp.ne.s32.totalorder %s1195_s23, %s1191_s22  ;;  %p116_p10 = scmp.eq.s32.totalorder %s1207_s26, 0 }
  0x11   : > { %1020 = dma.hbm_to_vmem [thread:$0]  (!%p1018_p7), %s232_s8, 16384, %s234_s11, [#allocation4], %s1210_s12, %s1210_s12, %s1211_s13  }
  0x12   : > { %s1497_s14 = smov (%p31_p8, %s30_s14), 0  ;;  %p1310_p11 = por %p116_p10, %p115_p9 }
  0x13   : > { %p1026_p12 = scmp.lt.s32.totalorder %s1207_s26, 2  ;;  %s105_s17 = ssub.s32 %s1203_s25, %s1497_s14 }
  0x14   : > { %s250_s18 = sand.u32 1, %s1195_s23   ;;  %p106_p13 = scmp.eq.s32.totalorder %s105_s17, 0 }
  0x15   : > { %s997_s19 = sshll.u32 %s250_s18, 9  ;;  %s1010_s20 = sshll.u32 %s1203_s25, 5 }
  0x16   : > { %s1320_s21 = scalar_select %p106_p13, %s1195_s23, %s108_s15  }
  0x17   : > { %s259_s7 = scalar_lea.hbm %s1480_s3, %s1010_s20  ;;  %s254_s10 = scalar_lea.vmem [#allocation5], %s997_s19 }
  0x18   : > { %s260_s8 = sshll.u32 %s259_s7, 4  ;;  %s262_s11 = sshll.u32 %s254_s10, 4  ;;  %s261_s8 = int_to_ptr.hbm [resolvable:$true] %s260_s8  ;;  %s263_s11 = int_to_ptr.vmem [resolvable:$true] %s262_s11 }
  0x19   : > { %p1022_p0 = pnand %p1026_p12, %p1310_p11  ;;  %s251_s12 = scalar_lea.sflag [#allocation6], %s250_s18 }
  0x1a   : > { %s1212_s13 = smov 1024   ;;  %s1213_s1 = smov 512  }
  0x1b   : > { %s1214_s17 = smov 32   ;;  %282 = sbr.rel (%p1295_p5) target bundleno = 430 (0x1ae), region = 40 }
  0x1c   : > { %1024 = dma.hbm_to_vmem [thread:$0]  (!%p1022_p0), %s261_s8, 8192, %s263_s11, %s251_s12, %s1212_s13, %s1213_s1, %s1214_s17  }
  0x20   : > { %1178 = dma.done.wait (%p1280_p1), [#allocation4], 16384  }
  0x21   : > { %1180 = vsyncadd (%p1280_p1), [#allocation4], 4294950912  ;;  %s289_s15 = sand.u32 1, %s1191_s22  }
  0x22   : > { %s1002_s16 = sshll.u32 %s289_s15, 9  ;;  %s290_s19 = scalar_lea.sflag [#allocation6], %s289_s15 }
  0x23   : > { %s1336_s20 = scalar_lea.vmem [#allocation5], %s1002_s16 }
  0x24   : > { %1182 = dma.done.wait (%p1288_p4), %s290_s19, 8192  }
  0x25   : > { %1184 = vsyncadd (%p1288_p4), %s290_s19, 4294959104  ;;  %s1003_s1 = sshll.u32 %s1199_s24, 2  ;;  %p1006_p1 = scmp.ne.s32.totalorder %s1199_s24, 0 }
  0x26   : > { %p347_p2 = scmp.lt.s32.totalorder %s1003_s1, 7 }
  0x27   : > { %368 = sbr.rel (%p1006_p1) target bundleno = 255 (0xff), region = 52 }
  0x28   : > { %s1499_s1 = smov (!%p347_p2, %s1003_s1), 7 }
  0x29   : > { %s349_s18 = scalar_lea.vmem %s1481_s4, %s1499_s1  ;;  %s1005_s27 = sshll.u32 %s1499_s1, 3 }
  0x2a   : > { %s1353_s8 = scalar_lea.vmem %s1483_s6, %s1005_s27 }
  0x2c   : > { %v424_v0 = vld [vmem:[#allocation3 + $0x178] sm:$0xff]  ;;  %v423_v2 = vld [vmem:[#allocation3 + $0x170] sm:$0xff]  ;;  %v422_v6 = vld [vmem:[#allocation3 + $0x168] sm:$0xff] }
  0x2d   : > { %v392_v1 = vld [vmem:[#allocation3 + $0x78] sm:$0xff]  ;;  %549 = vmatpush.msra.mxu2 %v424_v0  ;;  %v391_v4 = vld [vmem:[#allocation3 + $0x70] sm:$0xff]  ;;  %v390_v8 = vld [vmem:[#allocation3 + $0x68] sm:$0xff] }
  0x2e   : > { %509 = vmatpush.msra.mxu0 %v392_v1  ;;  %v440_v3 = vld [vmem:[#allocation3 + $0x1f8] sm:$0xff]  ;;  %v439_v7 = vld [vmem:[#allocation3 + $0x1f0] sm:$0xff]  ;;  %v438_v10 = vld [vmem:[#allocation3 + $0x1e8] sm:$0xff] }
  0x2f   : > { %v408_v5 = vld [vmem:[#allocation3 + $0xf8] sm:$0xff]  ;;  %569 = vmatpush.msra.mxu3 %v440_v3  ;;  %550 = vmatpush.msra.mxu2 %v423_v2  ;;  %v407_v9 = vld [vmem:[#allocation3 + $0xf0] sm:$0xff]  ;;  %v421_v11 = vld [vmem:[#allocation3 + $0x160] sm:$0xff] }
  0x30   : > { %529 = vmatpush.msra.mxu1 %v408_v5  ;;  %510 = vmatpush.msra.mxu0 %v391_v4  ;;  %v389_v12 = vld [vmem:[#allocation3 + $0x60] sm:$0xff]  ;;  %v406_v13 = vld [vmem:[#allocation3 + $0xe8] sm:$0xff]  ;;  %v420_v16 = vld [vmem:[#allocation3 + $0x158] sm:$0xff] }
  0x31   : > { %570 = vmatpush.msra.mxu3 %v439_v7  ;;  %551 = vmatpush.msra.mxu2 %v422_v6  ;;  %v437_v14 = vld [vmem:[#allocation3 + $0x1e0] sm:$0xff]  ;;  %v388_v17 = vld [vmem:[#allocation3 + $0x58] sm:$0xff]  ;;  %v419_v20 = vld [vmem:[#allocation3 + $0x150] sm:$0xff] }
  0x32   : > { %530 = vmatpush.msra.mxu1 %v407_v9  ;;  %511 = vmatpush.msra.mxu0 %v390_v8  ;;  %v405_v15 = vld [vmem:[#allocation3 + $0xe0] sm:$0xff]  ;;  %v436_v18 = vld [vmem:[#allocation3 + $0x1d8] sm:$0xff]  ;;  %v387_v21 = vld [vmem:[#allocation3 + $0x50] sm:$0xff] }
  0x33   : > { %571 = vmatpush.msra.mxu3 %v438_v10  ;;  %552 = vmatpush.msra.mxu2 %v421_v11  ;;  %v404_v19 = vld [vmem:[#allocation3 + $0xd8] sm:$0xff]  ;;  %v435_v22 = vld [vmem:[#allocation3 + $0x1d0] sm:$0xff]  ;;  %v418_v24 = vld [vmem:[#allocation3 + $0x148] sm:$0xff] }
  0x34   : > { %531 = vmatpush.msra.mxu1 %v406_v13  ;;  %512 = vmatpush.msra.mxu0 %v389_v12  ;;  %v403_v23 = vld [vmem:[#allocation3 + $0xd0] sm:$0xff]  ;;  %v386_v25 = vld [vmem:[#allocation3 + $0x48] sm:$0xff]  ;;  %v417_v28 = vld [vmem:[#allocation3 + $0x140] sm:$0xff] }
  0x35   : > { %572 = vmatpush.msra.mxu3 %v437_v14  ;;  %553 = vmatpush.msra.mxu2 %v420_v16  ;;  %v434_v26 = vld [vmem:[#allocation3 + $0x1c8] sm:$0xff]  ;;  %v385_v29 = vld [vmem:[#allocation3 + $0x40] sm:$0xff]  ;;  %v416_v32 = vld [vmem:[#allocation3 + $0x138] sm:$0xff] }
  0x36   : > { %532 = vmatpush.msra.mxu1 %v405_v15  ;;  %513 = vmatpush.msra.mxu0 %v388_v17  ;;  %v402_v27 = vld [vmem:[#allocation3 + $0xc8] sm:$0xff]  ;;  %v433_v30 = vld [vmem:[#allocation3 + $0x1c0] sm:$0xff]  ;;  %v384_v33 = vld [vmem:[#allocation3 + $0x38] sm:$0xff] }
  0x37   : > { %573 = vmatpush.msra.mxu3 %v436_v18  ;;  %554 = vmatpush.msra.mxu2 %v419_v20  ;;  %v401_v31 = vld [vmem:[#allocation3 + $0xc0] sm:$0xff]  ;;  %v432_v34 = vld [vmem:[#allocation3 + $0x1b8] sm:$0xff]  ;;  %v415_v36 = vld [vmem:[#allocation3 + $0x130] sm:$0xff] }
  0x38   : > { %533 = vmatpush.msra.mxu1 %v404_v19  ;;  %514 = vmatpush.msra.mxu0 %v387_v21  ;;  %v400_v35 = vld [vmem:[#allocation3 + $0xb8] sm:$0xff]  ;;  %v383_v37 = vld [vmem:[#allocation3 + $0x30] sm:$0xff]  ;;  %v414_v40 = vld [vmem:[#allocation3 + $0x128] sm:$0xff] }
  0x39   : > { %574 = vmatpush.msra.mxu3 %v435_v22  ;;  %555 = vmatpush.msra.mxu2 %v418_v24  ;;  %v431_v38 = vld [vmem:[#allocation3 + $0x1b0] sm:$0xff]  ;;  %v382_v41 = vld [vmem:[#allocation3 + $0x28] sm:$0xff]  ;;  %v413_v44 = vld [vmem:[#allocation3 + $0x120] sm:$0xff] }
  0x3a   : > { %534 = vmatpush.msra.mxu1 %v403_v23  ;;  %515 = vmatpush.msra.mxu0 %v386_v25  ;;  %v399_v39 = vld [vmem:[#allocation3 + $0xb0] sm:$0xff]  ;;  %v430_v42 = vld [vmem:[#allocation3 + $0x1a8] sm:$0xff]  ;;  %v381_v45 = vld [vmem:[#allocation3 + $0x20] sm:$0xff] }
  0x3b   : > { %575 = vmatpush.msra.mxu3 %v434_v26  ;;  %556 = vmatpush.msra.mxu2 %v417_v28  ;;  %v398_v43 = vld [vmem:[#allocation3 + $0xa8] sm:$0xff]  ;;  %v429_v46 = vld [vmem:[#allocation3 + $0x1a0] sm:$0xff]  ;;  %v412_v48 = vld [vmem:[#allocation3 + $0x118] sm:$0xff] }
  0x3c   : > { %535 = vmatpush.msra.mxu1 %v402_v27  ;;  %516 = vmatpush.msra.mxu0 %v385_v29  ;;  %v397_v47 = vld [vmem:[#allocation3 + $0xa0] sm:$0xff]  ;;  %v380_v49 = vld [vmem:[#allocation3 + $0x18] sm:$0xff]  ;;  %v411_v52 = vld [vmem:[#allocation3 + $0x110] sm:$0xff] }
  0x3d   : > { %576 = vmatpush.msra.mxu3 %v433_v30  ;;  %557 = vmatpush.msra.mxu2 %v416_v32  ;;  %v428_v50 = vld [vmem:[#allocation3 + $0x198] sm:$0xff]  ;;  %v379_v53 = vld [vmem:[#allocation3 + $0x10] sm:$0xff]  ;;  %v410_v56 = vld [vmem:[#allocation3 + $0x108] sm:$0xff] }
  0x3e   : > { %536 = vmatpush.msra.mxu1 %v401_v31  ;;  %517 = vmatpush.msra.mxu0 %v384_v33  ;;  %v396_v51 = vld [vmem:[#allocation3 + $0x98] sm:$0xff]  ;;  %v427_v54 = vld [vmem:[#allocation3 + $0x190] sm:$0xff]  ;;  %v378_v57 = vld [vmem:[#allocation3 + $0x8] sm:$0xff] }
  0x3f   : > { %577 = vmatpush.msra.mxu3 %v432_v34  ;;  %558 = vmatpush.msra.mxu2 %v415_v36  ;;  %v395_v55 = vld [vmem:[#allocation3 + $0x90] sm:$0xff]  ;;  %v426_v58 = vld [vmem:[#allocation3 + $0x188] sm:$0xff]  ;;  %v409_v60 = vld [vmem:[#allocation3 + $0x100] sm:$0xff] }
  0x40   : > { %537 = vmatpush.msra.mxu1 %v400_v35  ;;  %518 = vmatpush.msra.mxu0 %v383_v37  ;;  %v394_v59 = vld [vmem:[#allocation3 + $0x88] sm:$0xff]  ;;  %v377_v61 = vld [vmem:[#allocation3] sm:$0xff]  ;;  %v488_v62 = vld [vmem:[#allocation3 + $0x378] sm:$0xff] }
  0x41   : > { %578 = vmatpush.msra.mxu3 %v431_v38  ;;  %559 = vmatpush.msra.mxu2 %v414_v40  ;;  %v425_v63 = vld [vmem:[#allocation3 + $0x180] sm:$0xff]  ;;  %v456_v0 = vld [vmem:[#allocation3 + $0x278] sm:$0xff]  ;;  %v487_v2 = vld [vmem:[#allocation3 + $0x370] sm:$0xff] }
  0x42   : > { %538 = vmatpush.msra.mxu1 %v399_v39  ;;  %519 = vmatpush.msra.mxu0 %v382_v41  ;;  %v504_v1 = vld [vmem:[#allocation3 + $0x3f8] sm:$0xff]  ;;  %v393_v3 = vld [vmem:[#allocation3 + $0x80] sm:$0xff]  ;;  %v455_v4 = vld [vmem:[#allocation3 + $0x270] sm:$0xff] }
  0x43   : > { %579 = vmatpush.msra.mxu3 %v430_v42  ;;  %560 = vmatpush.msra.mxu2 %v413_v44  ;;  %v472_v5 = vld [vmem:[#allocation3 + $0x2f8] sm:$0xff]  ;;  %v486_v6 = vld [vmem:[#allocation3 + $0x368] sm:$0xff]  ;;  %v503_v7 = vld [vmem:[#allocation3 + $0x3f0] sm:$0xff] }
  0x44   : > { %539 = vmatpush.msra.mxu1 %v398_v43  ;;  %520 = vmatpush.msra.mxu0 %v381_v45  ;;  %v454_v8 = vld [vmem:[#allocation3 + $0x268] sm:$0xff]  ;;  %v471_v9 = vld [vmem:[#allocation3 + $0x2f0] sm:$0xff]  ;;  %v485_v10 = vld [vmem:[#allocation3 + $0x360] sm:$0xff] }
  0x45   : > { %580 = vmatpush.msra.mxu3 %v429_v46  ;;  %561 = vmatpush.msra.mxu2 %v412_v48  ;;  %v502_v11 = vld [vmem:[#allocation3 + $0x3e8] sm:$0xff]  ;;  %v453_v12 = vld [vmem:[#allocation3 + $0x260] sm:$0xff]  ;;  %v484_v14 = vld [vmem:[#allocation3 + $0x358] sm:$0xff] }
  0x46   : > { %540 = vmatpush.msra.mxu1 %v397_v47  ;;  %521 = vmatpush.msra.mxu0 %v380_v49  ;;  %v470_v13 = vld [vmem:[#allocation3 + $0x2e8] sm:$0xff]  ;;  %v501_v15 = vld [vmem:[#allocation3 + $0x3e0] sm:$0xff]  ;;  %v452_v16 = vld [vmem:[#allocation3 + $0x258] sm:$0xff] }
  0x47   : > { %581 = vmatpush.msra.mxu3 %v428_v50  ;;  %562 = vmatpush.msra.mxu2 %v411_v52  ;;  %v469_v17 = vld [vmem:[#allocation3 + $0x2e0] sm:$0xff]  ;;  %v483_v18 = vld [vmem:[#allocation3 + $0x350] sm:$0xff]  ;;  %v500_v19 = vld [vmem:[#allocation3 + $0x3d8] sm:$0xff] }
  0x48   : > { %541 = vmatpush.msra.mxu1 %v396_v51  ;;  %522 = vmatpush.msra.mxu0 %v379_v53  ;;  %v451_v20 = vld [vmem:[#allocation3 + $0x250] sm:$0xff]  ;;  %v468_v21 = vld [vmem:[#allocation3 + $0x2d8] sm:$0xff]  ;;  %v482_v22 = vld [vmem:[#allocation3 + $0x348] sm:$0xff] }
  0x49   : > { %582 = vmatpush.msra.mxu3 %v427_v54  ;;  %563 = vmatpush.msra.mxu2 %v410_v56  ;;  %v499_v23 = vld [vmem:[#allocation3 + $0x3d0] sm:$0xff]  ;;  %v450_v24 = vld [vmem:[#allocation3 + $0x248] sm:$0xff]  ;;  %v481_v26 = vld [vmem:[#allocation3 + $0x340] sm:$0xff] }
  0x4a   : > { %542 = vmatpush.msra.mxu1 %v395_v55  ;;  %523 = vmatpush.msra.mxu0 %v378_v57  ;;  %v467_v25 = vld [vmem:[#allocation3 + $0x2d0] sm:$0xff]  ;;  %v498_v27 = vld [vmem:[#allocation3 + $0x3c8] sm:$0xff]  ;;  %v449_v28 = vld [vmem:[#allocation3 + $0x240] sm:$0xff] }
  0x4b   : > { %583 = vmatpush.msra.mxu3 %v426_v58  ;;  %564 = vmatpush.msra.mxu2 %v409_v60  ;;  %v466_v29 = vld [vmem:[#allocation3 + $0x2c8] sm:$0xff]  ;;  %v480_v30 = vld [vmem:[#allocation3 + $0x338] sm:$0xff]  ;;  %v497_v31 = vld [vmem:[#allocation3 + $0x3c0] sm:$0xff] }
  0x4c   : > { %543 = vmatpush.msra.mxu1 %v394_v59  ;;  %524 = vmatpush.msra.mxu0 %v377_v61  ;;  %v448_v32 = vld [vmem:[#allocation3 + $0x238] sm:$0xff]  ;;  %v465_v33 = vld [vmem:[#allocation3 + $0x2c0] sm:$0xff]  ;;  %v479_v34 = vld [vmem:[#allocation3 + $0x330] sm:$0xff] }
  0x4d   : > { %629 = vmatpush.msrb.mxu2 %v488_v62  ;;  %584 = vmatpush.msra.mxu3 %v425_v63  ;;  %v496_v35 = vld [vmem:[#allocation3 + $0x3b8] sm:$0xff]  ;;  %v447_v36 = vld [vmem:[#allocation3 + $0x230] sm:$0xff]  ;;  %v478_v38 = vld [vmem:[#allocation3 + $0x328] sm:$0xff] }
  0x4e   : > { %589 = vmatpush.msrb.mxu0 %v456_v0  ;;  %544 = vmatpush.msra.mxu1 %v393_v3  ;;  %v464_v37 = vld [vmem:[#allocation3 + $0x2b8] sm:$0xff]  ;;  %v495_v39 = vld [vmem:[#allocation3 + $0x3b0] sm:$0xff]  ;;  %v446_v40 = vld [vmem:[#allocation3 + $0x228] sm:$0xff] }
  0x4f   : > { %649 = vmatpush.msrb.mxu3 %v504_v1  ;;  %630 = vmatpush.msrb.mxu2 %v487_v2  ;;  %v463_v41 = vld [vmem:[#allocation3 + $0x2b0] sm:$0xff]  ;;  %v477_v42 = vld [vmem:[#allocation3 + $0x320] sm:$0xff]  ;;  %v494_v43 = vld [vmem:[#allocation3 + $0x3a8] sm:$0xff] }
  0x50   : > { %590 = vmatpush.msrb.mxu0 %v455_v4  ;;  %609 = vmatpush.msrb.mxu1 %v472_v5  ;;  %v371_v44 = vld [vmem:[%s1477_s0 + $0x10] sm:$0xff]  ;;  %v445_v45 = vld [vmem:[#allocation3 + $0x220] sm:$0xff]  ;;  %v476_v47 = vld [vmem:[#allocation3 + $0x318] sm:$0xff] }
  0x51   : > { %631 = vmatpush.msrb.mxu2 %v486_v6  ;;  %650 = vmatpush.msrb.mxu3 %v503_v7  ;;  %v462_v46 = vld [vmem:[#allocation3 + $0x2a8] sm:$0xff]  ;;  %v493_v48 = vld [vmem:[#allocation3 + $0x3a0] sm:$0xff]  ;;  %v369_v49 = vld [vmem:[%s1477_s0] sm:$0xff] }
  0x52   : > { %591 = vmatpush.msrb.mxu0 %v454_v8  ;;  %610 = vmatpush.msrb.mxu1 %v471_v9  ;;  %v372_v50 = vld [vmem:[%s1477_s0 + $0x18] sm:$0xff]  ;;  %v444_v51 = vld [vmem:[#allocation3 + $0x218] sm:$0xff]  ;;  %v461_v52 = vld [vmem:[#allocation3 + $0x2a0] sm:$0xff] }
  0x53   : > { %632 = vmatpush.msrb.mxu2 %v485_v10  ;;  %651 = vmatpush.msrb.mxu3 %v502_v11  ;;  %v475_v53 = vld [vmem:[#allocation3 + $0x310] sm:$0xff]  ;;  %v492_v54 = vld [vmem:[#allocation3 + $0x398] sm:$0xff]  ;;  %v370_v55 = vld [vmem:[%s1477_s0 + $0x8] sm:$0xff] }
  0x54   : > { %592 = vmatpush.msrb.mxu0 %v453_v12  ;;  %611 = vmatpush.msrb.mxu1 %v470_v13  ;;  %v443_v56 = vld [vmem:[#allocation3 + $0x210] sm:$0xff]  ;;  %v460_v57 = vld [vmem:[#allocation3 + $0x298] sm:$0xff]  ;;  %v474_v58 = vld [vmem:[#allocation3 + $0x308] sm:$0xff] }
  0x55   : > { %633 = vmatpush.msrb.mxu2 %v484_v14  ;;  %652 = vmatpush.msrb.mxu3 %v501_v15  ;;  %v491_v59 = vld [vmem:[#allocation3 + $0x390] sm:$0xff]  ;;  %v442_v60 = vld [vmem:[#allocation3 + $0x208] sm:$0xff]  ;;  %v473_v62 = vld [vmem:[#allocation3 + $0x300] sm:$0xff] }
  0x56   : > { %593 = vmatpush.msrb.mxu0 %v452_v16  ;;  %612 = vmatpush.msrb.mxu1 %v469_v17  ;;  %v459_v61 = vld [vmem:[#allocation3 + $0x290] sm:$0xff]  ;;  %v490_v63 = vld [vmem:[#allocation3 + $0x388] sm:$0xff]  ;;  %v441_v1 = vld [vmem:[#allocation3 + $0x200] sm:$0xff] }
  0x57   : > { %634 = vmatpush.msrb.mxu2 %v483_v18  ;;  %653 = vmatpush.msrb.mxu3 %v500_v19  ;;  %v375_v0 = vld [vmem:[%s1477_s0 + $0x30] sm:$0xff]  ;;  %v489_v3 = vld [vmem:[#allocation3 + $0x380] sm:$0xff]  ;;  %v373_v4 = vld [vmem:[%s1477_s0 + $0x20] sm:$0xff] }
  0x58   : > { %594 = vmatpush.msrb.mxu0 %v451_v20  ;;  %613 = vmatpush.msrb.mxu1 %v468_v21  ;;  %v458_v2 = vld [vmem:[#allocation3 + $0x288] sm:$0xff]  ;;  %v376_v5 = vld [vmem:[%s1477_s0 + $0x38] sm:$0xff]  ;;  %v457_v6 = vld [vmem:[#allocation3 + $0x280] sm:$0xff] }
  0x59   : > { %635 = vmatpush.msrb.mxu2 %v482_v22  ;;  %654 = vmatpush.msrb.mxu3 %v499_v23  ;;  %v374_v7 = vld [vmem:[%s1477_s0 + $0x28] sm:$0xff]  ;;  %v1082_v8 = vld [vmem:[%s1479_s2] ss:$0 sm:$0xff] }
  0x5a   : > { %595 = vmatpush.msrb.mxu0 %v450_v24  ;;  %614 = vmatpush.msrb.mxu1 %v467_v25 }
  0x5b   : > { %636 = vmatpush.msrb.mxu2 %v481_v26  ;;  %655 = vmatpush.msrb.mxu3 %v498_v27 }
  0x5c   : > { %596 = vmatpush.msrb.mxu0 %v449_v28  ;;  %615 = vmatpush.msrb.mxu1 %v466_v29 }
  0x5d   : > { %637 = vmatpush.msrb.mxu2 %v480_v30  ;;  %656 = vmatpush.msrb.mxu3 %v497_v31 }
  0x5e   : > { %597 = vmatpush.msrb.mxu0 %v448_v32  ;;  %616 = vmatpush.msrb.mxu1 %v465_v33 }
  0x5f   : > { %638 = vmatpush.msrb.mxu2 %v479_v34  ;;  %657 = vmatpush.msrb.mxu3 %v496_v35 }
  0x60   : > { %598 = vmatpush.msrb.mxu0 %v447_v36  ;;  %617 = vmatpush.msrb.mxu1 %v464_v37 }
  0x61   : > { %639 = vmatpush.msrb.mxu2 %v478_v38  ;;  %658 = vmatpush.msrb.mxu3 %v495_v39 }
  0x62   : > { %599 = vmatpush.msrb.mxu0 %v446_v40  ;;  %618 = vmatpush.msrb.mxu1 %v463_v41 }
  0x63   : > { %640 = vmatpush.msrb.mxu2 %v477_v42  ;;  %659 = vmatpush.msrb.mxu3 %v494_v43 }
  0x64   : > { %565 = vmatmul.f32.vlgmr.msra.gmra.mxu2 %v371_v44  ;;  %600 = vmatpush.msrb.mxu0 %v445_v45 }
  0x65   : > { %619 = vmatpush.msrb.mxu1 %v462_v46  ;;  %641 = vmatpush.msrb.mxu2 %v476_v47 }
  0x66   : > { %660 = vmatpush.msrb.mxu3 %v493_v48  ;;  %525 = vmatmul.f32.vlgmr.msra.gmra.mxu0 %v369_v49 }
  0x67   : > { %585 = vmatmul.f32.vlgmr.msra.gmra.mxu3 %v372_v50  ;;  %601 = vmatpush.msrb.mxu0 %v444_v51 }
  0x68   : > { %620 = vmatpush.msrb.mxu1 %v461_v52  ;;  %642 = vmatpush.msrb.mxu2 %v475_v53 }
  0x69   : > { %661 = vmatpush.msrb.mxu3 %v492_v54  ;;  %545 = vmatmul.f32.vlgmr.msra.gmra.mxu1 %v370_v55 }
  0x6a   : > { %602 = vmatpush.msrb.mxu0 %v443_v56  ;;  %621 = vmatpush.msrb.mxu1 %v460_v57 }
  0x6b   : > { %643 = vmatpush.msrb.mxu2 %v474_v58  ;;  %662 = vmatpush.msrb.mxu3 %v491_v59 }
  0x6c   : > { %603 = vmatpush.msrb.mxu0 %v442_v60  ;;  %622 = vmatpush.msrb.mxu1 %v459_v61 }
  0x6d   : > { %644 = vmatpush.msrb.mxu2 %v473_v62  ;;  %663 = vmatpush.msrb.mxu3 %v490_v63 }
  0x6e   : > { %645 = vmatmul.f32.vlgmr.msrb.gmra.mxu2 %v375_v0  ;;  %604 = vmatpush.msrb.mxu0 %v441_v1 }
  0x6f   : > { %623 = vmatpush.msrb.mxu1 %v458_v2  ;;  %664 = vmatpush.msrb.mxu3 %v489_v3 }
  0x70   : > { %605 = vmatmul.f32.vlgmr.msrb.gmra.mxu0 %v373_v4  ;;  %665 = vmatmul.f32.vlgmr.msrb.gmra.mxu3 %v376_v5 }
  0x71   : > { %624 = vmatpush.msrb.mxu1 %v457_v6 }
  0x72   : > { %625 = vmatmul.f32.vlgmr.msrb.gmra.mxu1 %v374_v7 }
  0xe3   : > { %v526_v9 = vpop.f32.mrf.mxu0 }
  0xe4   : > { %v527_v10 = vadd.f32 %v1082_v8, %v526_v9 }
  0xe6   : > { %v546_v11 = vpop.f32.mrf.mxu1 }
  0xe7   : > { %v547_v12 = vadd.f32 %v546_v11, %v527_v10  ;;  %v566_v13 = vpop.f32.mrf.mxu2 }
  0xe9   : > { %v567_v14 = vadd.f32 %v566_v13, %v547_v12 }
  0xea   : > { %v586_v15 = vpop.f32.mrf.mxu3 }
  0xeb   : > { %v587_v16 = vadd.f32 %v586_v15, %v567_v14 }
  0xed   : > { %v606_v17 = vpop.f32.mrf.mxu0 }
  0xee   : > { %v607_v18 = vadd.f32 %v606_v17, %v587_v16 }
  0xef   : > { %v626_v19 = vpop.f32.mrf.mxu1 }
  0xf0   : > { %v627_v20 = vadd.f32 %v626_v19, %v607_v18 }
  0xf1   : > { %v646_v21 = vpop.f32.mrf.mxu2 }
  0xf2   : > { %v647_v22 = vadd.f32 %v646_v21, %v627_v20 }
  0xf3   : > { %v666_v23 = vpop.f32.mrf.mxu3 }
  0xf4   : > { %v667_v24 = vadd.f32 %v666_v23, %v647_v22 }
  0xf6   : > { %1083 = vtanh.f32 %v667_v24 }
  0xfc   : > { %v1084_v25 = vpop.eup %1083 }
  0xfd   : > { %670 = vst [vmem:[#allocation2] sm:$0xff] %v1084_v25 }
  0xfe   : > { %671 = vst [vmem:[%s1482_s5] sm:$0xff] %v1084_v25 }
  0xff PF: > { %v735_v26 = vld [vmem:[%s1336_s20 + $0x1f0] sm:$0xff]  ;;  %v736_v27 = vld [vmem:[%s1336_s20 + $0x1f8] sm:$0xff]  ;;  %v733_v30 = vld [vmem:[%s1336_s20 + $0x1e0] sm:$0xff] }
 0x100   : > { %v731_v28 = vld [vmem:[%s1336_s20 + $0x1d0] sm:$0xff]  ;;  %787 = vmatpush.msra.mxu2 %v735_v26  ;;  %807 = vmatpush.msra.mxu3 %v736_v27  ;;  %v732_v29 = vld [vmem:[%s1336_s20 + $0x1d8] sm:$0xff]  ;;  %v734_v32 = vld [vmem:[%s1336_s20 + $0x1e8] sm:$0xff] }
 0x101   : > { %v727_v31 = vld [vmem:[%s1336_s20 + $0x1b0] sm:$0xff]  ;;  %747 = vmatpush.msra.mxu0 %v733_v30  ;;  %v728_v33 = vld [vmem:[%s1336_s20 + $0x1b8] sm:$0xff]  ;;  %v729_v34 = vld [vmem:[%s1336_s20 + $0x1c0] sm:$0xff]  ;;  %767 = vmatpush.msra.mxu1 %v734_v32 }
 0x102   : > { %788 = vmatpush.msra.mxu2 %v731_v28  ;;  %808 = vmatpush.msra.mxu3 %v732_v29  ;;  %v730_v35 = vld [vmem:[%s1336_s20 + $0x1c8] sm:$0xff]  ;;  %v723_v36 = vld [vmem:[%s1336_s20 + $0x190] sm:$0xff]  ;;  %v724_v37 = vld [vmem:[%s1336_s20 + $0x198] sm:$0xff] }
 0x103   : > { %748 = vmatpush.msra.mxu0 %v729_v34  ;;  %v725_v38 = vld [vmem:[%s1336_s20 + $0x1a0] sm:$0xff]  ;;  %v726_v39 = vld [vmem:[%s1336_s20 + $0x1a8] sm:$0xff]  ;;  %768 = vmatpush.msra.mxu1 %v730_v35  ;;  %v719_v41 = vld [vmem:[%s1336_s20 + $0x170] sm:$0xff] }
 0x104   : > { %789 = vmatpush.msra.mxu2 %v727_v31  ;;  %809 = vmatpush.msra.mxu3 %v728_v33  ;;  %v721_v40 = vld [vmem:[%s1336_s20 + $0x180] sm:$0xff]  ;;  %v720_v42 = vld [vmem:[%s1336_s20 + $0x178] sm:$0xff]  ;;  %v722_v43 = vld [vmem:[%s1336_s20 + $0x188] sm:$0xff] }
 0x105   : > { %749 = vmatpush.msra.mxu0 %v725_v38  ;;  %v717_v44 = vld [vmem:[%s1336_s20 + $0x160] sm:$0xff]  ;;  %769 = vmatpush.msra.mxu1 %v726_v39  ;;  %v715_v45 = vld [vmem:[%s1336_s20 + $0x150] sm:$0xff]  ;;  %v716_v46 = vld [vmem:[%s1336_s20 + $0x158] sm:$0xff] }
 0x106   : > { %790 = vmatpush.msra.mxu2 %v723_v36  ;;  %810 = vmatpush.msra.mxu3 %v724_v37  ;;  %v718_v47 = vld [vmem:[%s1336_s20 + $0x168] sm:$0xff]  ;;  %v713_v48 = vld [vmem:[%s1336_s20 + $0x140] sm:$0xff]  ;;  %v711_v49 = vld [vmem:[%s1336_s20 + $0x130] sm:$0xff] }
 0x107   : > { %750 = vmatpush.msra.mxu0 %v721_v40  ;;  %770 = vmatpush.msra.mxu1 %v722_v43  ;;  %v712_v50 = vld [vmem:[%s1336_s20 + $0x138] sm:$0xff]  ;;  %v714_v51 = vld [vmem:[%s1336_s20 + $0x148] sm:$0xff]  ;;  %v709_v52 = vld [vmem:[%s1336_s20 + $0x120] sm:$0xff] }
 0x108   : > { %791 = vmatpush.msra.mxu2 %v719_v41  ;;  %811 = vmatpush.msra.mxu3 %v720_v42  ;;  %v707_v53 = vld [vmem:[%s1336_s20 + $0x110] sm:$0xff]  ;;  %v708_v54 = vld [vmem:[%s1336_s20 + $0x118] sm:$0xff]  ;;  %v710_v55 = vld [vmem:[%s1336_s20 + $0x128] sm:$0xff] }
 0x109   : > { %751 = vmatpush.msra.mxu0 %v717_v44  ;;  %771 = vmatpush.msra.mxu1 %v718_v47  ;;  %v705_v56 = vld [vmem:[%s1336_s20 + $0x100] sm:$0xff]  ;;  %v703_v57 = vld [vmem:[%s1336_s20 + $0xf0] sm:$0xff]  ;;  %v704_v58 = vld [vmem:[%s1336_s20 + $0xf8] sm:$0xff] }
 0x10a   : > { %792 = vmatpush.msra.mxu2 %v715_v45  ;;  %812 = vmatpush.msra.mxu3 %v716_v46  ;;  %v706_v59 = vld [vmem:[%s1336_s20 + $0x108] sm:$0xff]  ;;  %v701_v60 = vld [vmem:[%s1336_s20 + $0xe0] sm:$0xff]  ;;  %v699_v61 = vld [vmem:[%s1336_s20 + $0xd0] sm:$0xff] }
 0x10b   : > { %752 = vmatpush.msra.mxu0 %v713_v48  ;;  %772 = vmatpush.msra.mxu1 %v714_v51  ;;  %v700_v62 = vld [vmem:[%s1336_s20 + $0xd8] sm:$0xff]  ;;  %v702_v63 = vld [vmem:[%s1336_s20 + $0xe8] sm:$0xff]  ;;  %v697_v0 = vld [vmem:[%s1336_s20 + $0xc0] sm:$0xff] }
 0x10c   : > { %793 = vmatpush.msra.mxu2 %v711_v49  ;;  %813 = vmatpush.msra.mxu3 %v712_v50  ;;  %v695_v1 = vld [vmem:[%s1336_s20 + $0xb0] sm:$0xff]  ;;  %v696_v2 = vld [vmem:[%s1336_s20 + $0xb8] sm:$0xff]  ;;  %v698_v3 = vld [vmem:[%s1336_s20 + $0xc8] sm:$0xff] }
 0x10d   : > { %753 = vmatpush.msra.mxu0 %v709_v52  ;;  %773 = vmatpush.msra.mxu1 %v710_v55  ;;  %v693_v4 = vld [vmem:[%s1336_s20 + $0xa0] sm:$0xff]  ;;  %v691_v5 = vld [vmem:[%s1336_s20 + $0x90] sm:$0xff]  ;;  %v692_v6 = vld [vmem:[%s1336_s20 + $0x98] sm:$0xff] }
 0x10e   : > { %794 = vmatpush.msra.mxu2 %v707_v53  ;;  %814 = vmatpush.msra.mxu3 %v708_v54  ;;  %v694_v7 = vld [vmem:[%s1336_s20 + $0xa8] sm:$0xff]  ;;  %v689_v8 = vld [vmem:[%s1336_s20 + $0x80] sm:$0xff]  ;;  %v687_v9 = vld [vmem:[%s1336_s20 + $0x70] sm:$0xff] }
 0x10f   : > { %754 = vmatpush.msra.mxu0 %v705_v56  ;;  %774 = vmatpush.msra.mxu1 %v706_v59  ;;  %v688_v10 = vld [vmem:[%s1336_s20 + $0x78] sm:$0xff]  ;;  %v690_v11 = vld [vmem:[%s1336_s20 + $0x88] sm:$0xff]  ;;  %v685_v12 = vld [vmem:[%s1336_s20 + $0x60] sm:$0xff] }
 0x110   : > { %795 = vmatpush.msra.mxu2 %v703_v57  ;;  %815 = vmatpush.msra.mxu3 %v704_v58  ;;  %v683_v13 = vld [vmem:[%s1336_s20 + $0x50] sm:$0xff]  ;;  %v684_v14 = vld [vmem:[%s1336_s20 + $0x58] sm:$0xff]  ;;  %v686_v15 = vld [vmem:[%s1336_s20 + $0x68] sm:$0xff] }
 0x111   : > { %755 = vmatpush.msra.mxu0 %v701_v60  ;;  %775 = vmatpush.msra.mxu1 %v702_v63  ;;  %v681_v16 = vld [vmem:[%s1336_s20 + $0x40] sm:$0xff]  ;;  %v679_v17 = vld [vmem:[%s1336_s20 + $0x30] sm:$0xff]  ;;  %v680_v18 = vld [vmem:[%s1336_s20 + $0x38] sm:$0xff] }
 0x112   : > { %796 = vmatpush.msra.mxu2 %v699_v61  ;;  %816 = vmatpush.msra.mxu3 %v700_v62  ;;  %v682_v19 = vld [vmem:[%s1336_s20 + $0x48] sm:$0xff]  ;;  %v677_v20 = vld [vmem:[%s1336_s20 + $0x20] sm:$0xff]  ;;  %v675_v21 = vld [vmem:[%s1336_s20 + $0x10] sm:$0xff] }
 0x113   : > { %756 = vmatpush.msra.mxu0 %v697_v0  ;;  %776 = vmatpush.msra.mxu1 %v698_v3  ;;  %v676_v22 = vld [vmem:[%s1336_s20 + $0x18] sm:$0xff]  ;;  %v678_v24 = vld [vmem:[%s1336_s20 + $0x28] sm:$0xff]  ;;  %v673_v25 = vld [vmem:[%s1336_s20] sm:$0xff] }
 0x114   : > { %797 = vmatpush.msra.mxu2 %v695_v1  ;;  %817 = vmatpush.msra.mxu3 %v696_v2  ;;  %v672_v23 = vld [vmem:[#allocation2] sm:$0xff]  ;;  %v674_v26 = vld [vmem:[%s1336_s20 + $0x8] sm:$0xff] }
 0x115   : > { %757 = vmatpush.msra.mxu0 %v693_v4  ;;  %777 = vmatpush.msra.mxu1 %v694_v7  ;;  %v737_v27 = vld [vmem:[%s349_s18] sm:$0xf] }
 0x116   : > { %798 = vmatpush.msra.mxu2 %v691_v5  ;;  %818 = vmatpush.msra.mxu3 %v692_v6  ;;  %v739_v28 = vperm.slane %v737_v27, 0  ;;  %v740_v29 = vperm.slane %v737_v27, 1  ;;  %v741_v32 = vperm.slane %v737_v27, 2  ;;  %v742_v33 = vperm.slane %v737_v27, 3 }
 0x117   : > { %758 = vmatpush.msra.mxu0 %v689_v8  ;;  %778 = vmatpush.msra.mxu1 %v690_v11 }
 0x118   : > { %799 = vmatpush.msra.mxu2 %v687_v9  ;;  %819 = vmatpush.msra.mxu3 %v688_v10 }
 0x119   : > { %759 = vmatpush.msra.mxu0 %v685_v12  ;;  %779 = vmatpush.msra.mxu1 %v686_v15 }
 0x11a   : > { %800 = vmatpush.msra.mxu2 %v683_v13  ;;  %820 = vmatpush.msra.mxu3 %v684_v14 }
 0x11b   : > { %760 = vmatpush.msra.mxu0 %v681_v16  ;;  %780 = vmatpush.msra.mxu1 %v682_v19 }
 0x11c   : > { %801 = vmatpush.msra.mxu2 %v679_v17  ;;  %821 = vmatpush.msra.mxu3 %v680_v18 }
 0x11d   : > { %761 = vmatpush.msra.mxu0 %v677_v20  ;;  %781 = vmatpush.msra.mxu1 %v678_v24 }
 0x11e   : > { %802 = vmatpush.msra.mxu2 %v675_v21  ;;  %822 = vmatpush.msra.mxu3 %v676_v22 }
 0x11f   : > { %803 = vmatmul.f32.vlgmr.msra.gmra.mxu2 %v672_v23  ;;  %823 = vmatmul.f32.vlgmr.msra.gmra.mxu3 %v672_v23 }
 0x120   : > { %762 = vmatpush.msra.mxu0 %v673_v25  ;;  %782 = vmatpush.msra.mxu1 %v674_v26 }
 0x121   : > { %763 = vmatmul.f32.vlgmr.msra.gmra.mxu0 %v672_v23  ;;  %783 = vmatmul.f32.vlgmr.msra.gmra.mxu1 %v672_v23 }
 0x19e   : > { %v764_v30 = vpop.f32.mrf.mxu0  ;;  %v784_v34 = vpop.f32.mrf.mxu1 }
 0x19f   : > { %v765_v31 = vadd.f32 %v764_v30, %v739_v28  ;;  %v785_v35 = vadd.f32 %v784_v34, %v740_v29 }
 0x1a1   : > { %1085 = vtanh.f32 %v765_v31 }
 0x1a2   : > { %v804_v36 = vpop.f32.mrf.mxu2  ;;  %v824_v37 = vpop.f32.mrf.mxu3  ;;  %1087 = vtanh.f32 %v785_v35 }
 0x1a3   : > { %v805_v38 = vadd.f32 %v804_v36, %v741_v32  ;;  %v825_v39 = vadd.f32 %v824_v37, %v742_v33 }
 0x1a5   : > { %1089 = vtanh.f32 %v805_v38 }
 0x1a6   : > { %1091 = vtanh.f32 %v825_v39 }
 0x1a7   : > { %v1086_v40 = vpop.eup %1085 }
 0x1a8   : > { %831 = vst [vmem:[%s1353_s8] sm:$0xff] %v1086_v40  ;;  %v1088_v41 = vpop.eup %1087 }
 0x1a9   : > { %832 = vst [vmem:[%s1353_s8 + $0x8] sm:$0xff] %v1088_v41 }
 0x1ab   : > { %v1090_v42 = vpop.eup %1089 }
 0x1ac   : > { %v1092_v43 = vpop.eup %1091  ;;  %833 = vst [vmem:[%s1353_s8 + $0x10] sm:$0xff] %v1090_v42 }
 0x1ad   : > { %834 = vst [vmem:[%s1353_s8 + $0x18] sm:$0xff] %v1092_v43 }
 0x1ae PF: > { %s21_s26 = sadd.s32 1, %s1207_s26   ;;  %s1490_s20 = smov %s1320_s21 }
 0x1af   : > { %p18_p3 = scmp.ge.s32.totalorder %s21_s26, 4   ;;  %s1491_s21 = smov %s1191_s22 }
 0x1b0   : > { %s1492_s22 = smov %s1195_s23  ;;  %s1493_s23 = smov %s1490_s20 }
 0x1b1   : > { %s1494_s24 = smov %s1203_s25  ;;  %s1495_s25 = smov %s1497_s14 }
 0x1b2   :  { %20 = sbr.rel (!%p18_p3) target bundleno = 7 (0x7), region = 107 }
 0x1b7   :  { %879 = vsyncpa [#allocation4], 1 }
 0x1b8   :  { %881 = vsyncpa [#allocation4 + $0x1], 1 }
 0x1b9   :  { %882 = vsyncpa [#allocation6], 1 }
 0x1ba   :  { %884 = vsyncpa [#allocation6 + $0x1], 1 }

</bundles_post_ra>
